<compile_context>
chip_gen: v5e
topology: v5e:2x2
jax: 0.10.0
libtpu: 0.0.40
codegen_flags: <defaults>
</compile_context>

<pallas_src>
import functools

import jax
import jax.numpy as jnp
from jax import lax
from jax.experimental import pallas as pl
from jax.experimental.pallas import tpu as pltpu


def _mhsa_kernel(*refs, heads, use_pos):
    if use_pos:
        (x_ref, wq_ref, bq_ref, wk_ref, bk_ref, wv_ref, bv_ref,
         pos_ref, o_ref, q_s, k_s, v_s) = refs
    else:
        (x_ref, wq_ref, bq_ref, wk_ref, bk_ref, wv_ref, bv_ref,
         o_ref, q_s, k_s, v_s) = refs
        pos_ref = None

    bt, C, N = x_ref.shape
    d = C // heads
    cdt = x_ref.dtype                       # MXU operand dtype (bf16 stays bf16)

    # Constant-index_map operands: fetched once by the pipeline, loaded once here.
    wq, wk, wv = wq_ref[...], wk_ref[...], wv_ref[...]
    bq, bk, bv = bq_ref[...], bk_ref[...], bv_ref[...]   # [C, 1] f32

    dn_qTk = (((0,), (0,)), ((), ()))   # contract dim0/dim0: q^T k  (no .T copy)
    dn_vAt = (((1,), (1,)), ((), ()))   # contract dim1/dim1: v @ attn^T (no .T copy)

    def batch_body(b, carry):
        xb = x_ref[b]                    # [C, N]

        # 1x1-conv projections: [C,C] @ [C,N] MXU matmuls, f32 accumulate,
        # bias add in f32, then cast straight back to the compute dtype so the
        # attention matmuls below run the (bf16) MXU path and q/k/v VMEM halves.
        q_s[...] = (jnp.dot(wq, xb, preferred_element_type=jnp.float32) + bq).astype(cdt)
        k_s[...] = (jnp.dot(wk, xb, preferred_element_type=jnp.float32) + bk).astype(cdt)
        v_s[...] = (jnp.dot(wv, xb, preferred_element_type=jnp.float32) + bv).astype(cdt)

        def head_body(h, carry_h):
            r0 = pl.multiple_of(h * d, d)
            qh = q_s[pl.ds(r0, d), :]    # [d, N]
            kh = k_s[pl.ds(r0, d), :]
            vh = v_s[pl.ds(r0, d), :]

            # energy[i, j] = sum_d q[d, i] * k[d, j]
            energy = lax.dot_general(qh, kh, dn_qTk,
                                     preferred_element_type=jnp.float32)
            if use_pos:
                ph = pos_ref[h]          # [d, N], compute dtype
                # content_position[i, j] = sum_d pos[d, i] * q[d, j]
                energy = energy + lax.dot_general(
                    ph, qh, dn_qTk, preferred_element_type=jnp.float32)

            m = jnp.max(energy, axis=-1, keepdims=True)
            e = jnp.exp(energy - m)
            attn = e * pl.reciprocal(jnp.sum(e, axis=-1, keepdims=True),
                                     approx=True)

            # out[d, i] = sum_j v[d, j] * attn[i, j]
            outh = lax.dot_general(vh, attn.astype(cdt), dn_vAt,
                                   preferred_element_type=jnp.float32)
            # Direct per-head store into the output block -- no concatenates.
            o_ref[b, pl.ds(r0, d), :] = outh.astype(o_ref.dtype)
            return carry_h

        lax.fori_loop(0, heads, head_body, 0)
        return carry

    lax.fori_loop(0, bt, batch_body, 0)


def _vmem_capacity_bytes():
    """Per-core VMEM capacity; conservative 64 MiB fallback (v7x)."""
    try:
        cap = getattr(pltpu.get_tpu_info(), "vmem_capacity_bytes", None)
        if cap:
            return int(cap)
    except Exception:
        pass
    return 64 * 2 ** 20


def _vmem_footprint_bytes(b_tile, C, N, heads, in_bytes, pos_emb):
    """Dtype-aware per-grid-step VMEM working set (double-buffered blocks)."""
    f32 = 4
    d = C // heads
    blocks = 2 * 2 * b_tile * C * N * in_bytes       # x + out blocks, 2 buffers each
    weights = 2 * 3 * (C * C * in_bytes + C * f32)   # Wq/Wk/Wv + f32 biases, 2 buffers
    pos = 2 * C * N * in_bytes if pos_emb else 0     # heads * d == C
    stage = 3 * C * N * in_bytes                     # q/k/v scratch (one batch at a time)
    proj = 3 * C * N * f32                           # f32 projection accumulators pre-cast
    attn = 3 * N * N * f32 + 2 * d * N * f32         # energy/exp/attn + per-head tiles
    return blocks + weights + pos + stage + proj + attn


def _pick_b_tile(B, C, N, heads, in_bytes, pos_emb, budget):
    """Largest batch tile that fits the VMEM budget while keeping >= 2 grid
    steps (so both v7x TensorCores get work whenever B >= 2)."""
    best = 1
    for t in range(1, B + 1):
        if B % t:
            continue
        if B >= 2 and B // t < 2:
            continue
        if _vmem_footprint_bytes(t, C, N, heads, in_bytes, pos_emb) <= budget:
            best = t
    return best


def mhsa_pallas(x, params, *, heads, pos_emb):
    B, C, W, H = x.shape
    N = W * H
    assert C % heads == 0
    d = C // heads
    dt = x.dtype
    in_bytes = jnp.dtype(dt).itemsize

    # [B, C, N] in and out: free reshapes, no wrapper transposes (no extra HBM
    # round trips around the kernel).
    x3 = x.reshape(B, C, N)

    # Matmul operands stay in the input dtype; biases stay f32 (added onto the
    # f32 accumulator inside the kernel before the down-cast).
    wq = params["wq"].astype(dt)
    wk = params["wk"].astype(dt)
    wv = params["wv"].astype(dt)
    bq = params["bq"].astype(jnp.float32).reshape(C, 1)
    bk = params["bk"].astype(jnp.float32).reshape(C, 1)
    bv = params["bv"].astype(jnp.float32).reshape(C, 1)

    phys = _vmem_capacity_bytes()
    tile_budget = min(int(0.4 * phys), 48 * 2 ** 20)
    b_tile = _pick_b_tile(B, C, N, heads, in_bytes, pos_emb, tile_budget)

    args = [x3, wq, bq, wk, bk, wv, bv]
    in_specs = [
        pl.BlockSpec((b_tile, C, N), lambda i: (i, 0, 0)),   # x
        pl.BlockSpec((C, C), lambda i: (0, 0)),              # Wq
        pl.BlockSpec((C, 1), lambda i: (0, 0)),              # bq
        pl.BlockSpec((C, C), lambda i: (0, 0)),              # Wk
        pl.BlockSpec((C, 1), lambda i: (0, 0)),              # bk
        pl.BlockSpec((C, C), lambda i: (0, 0)),              # Wv
        pl.BlockSpec((C, 1), lambda i: (0, 0)),              # bv
    ]
    if pos_emb:
        # Keep pos lane-dense as [heads, d, N]; cast to the compute dtype.
        pos = (params["rel_h"] + params["rel_w"]).reshape(heads, d, N).astype(dt)
        args.append(pos)
        in_specs.append(pl.BlockSpec((heads, d, N), lambda i: (0, 0, 0)))
    # pos_emb == False: no dummy tensor is materialized or DMA'd.

    # Real dtype-aware footprint + 25% headroom; capped 12 MiB below physical
    # VMEM (Mosaic internal-scratch headroom on v7x, >64 MiB allowed on v5e/v6e).
    fp = _vmem_footprint_bytes(b_tile, C, N, heads, in_bytes, pos_emb)
    vmem_cap = max(phys - 12 * 2 ** 20, 32 * 2 ** 20)
    vmem_limit = int(min(vmem_cap, max(int(1.25 * fp), 32 * 2 ** 20)))

    kernel = functools.partial(_mhsa_kernel, heads=heads, use_pos=pos_emb)

    out3 = pl.pallas_call(
        kernel,
        out_shape=jax.ShapeDtypeStruct((B, C, N), dt),
        grid=(B // b_tile,),
        in_specs=in_specs,
        out_specs=pl.BlockSpec((b_tile, C, N), lambda i: (i, 0, 0)),
        scratch_shapes=[pltpu.VMEM((C, N), dt),    # q staging (compute dtype)
                        pltpu.VMEM((C, N), dt),    # k staging
                        pltpu.VMEM((C, N), dt)],   # v staging
        compiler_params=pltpu.CompilerParams(
            dimension_semantics=("parallel",),
            vmem_limit_bytes=vmem_limit),
    )(*args)

    return out3.reshape(B, C, W, H)


def mhsa_reference(x, params, *, heads, pos_emb):
    """Pure-JAX reference matching the PyTorch forward exactly."""
    B, C, W, H = x.shape
    N = W * H
    d = C // heads
    xf = x.reshape(B, C, N)

    def proj(w, b):
        y = jnp.einsum("oc,bcn->bon", w, xf) + b[None, :, None]
        return y.reshape(B, heads, d, N)

    q = proj(params["wq"], params["bq"])
    k = proj(params["wk"], params["bk"])
    v = proj(params["wv"], params["bv"])

    cc = jnp.einsum("bhdi,bhdj->bhij", q, k)
    if pos_emb:
        pos = (params["rel_h"] + params["rel_w"]).reshape(1, heads, d, N)
        pos = jnp.transpose(pos, (0, 1, 3, 2))[0]            # [heads, N, d]
        cp = jnp.einsum("hnd,bhdm->bhnm", pos, q)
        energy = cc + cp
    else:
        energy = cc
    attn = jax.nn.softmax(energy, axis=-1)
    out = jnp.einsum("bhdj,bhij->bhdi", v, attn)
    return out.reshape(B, C, W, H)


def init_params(key, C, W, H, heads, pos_emb):
    d = C // heads
    ks = jax.random.split(key, 8)
    scale = 0.1
    p = {
        "wq": scale * jax.random.normal(ks[0], (C, C), jnp.float32),
        "bq": scale * jax.random.normal(ks[1], (C,), jnp.float32),
        "wk": scale * jax.random.normal(ks[2], (C, C), jnp.float32),
        "bk": scale * jax.random.normal(ks[3], (C,), jnp.float32),
        "wv": scale * jax.random.normal(ks[4], (C, C), jnp.float32),
        "bv": scale * jax.random.normal(ks[5], (C,), jnp.float32),
    }
    if pos_emb:
        p["rel_h"] = scale * jax.random.normal(ks[6], (1, heads, d, 1, H), jnp.float32)
        p["rel_w"] = scale * jax.random.normal(ks[7], (1, heads, d, W, 1), jnp.float32)
    return p


if __name__ == "__main__":
    B, C, W, H = 2, 32, 8, 8
    heads = 4

    key = jax.random.PRNGKey(0)
    kx, kp = jax.random.split(key)
    x = jax.random.normal(kx, (B, C, W, H), jnp.float32)

    for pos_emb in (True, False):
        params = init_params(kp, C, W, H, heads, pos_emb)
        out = mhsa_pallas(x, params, heads=heads, pos_emb=pos_emb)
        out = jax.block_until_ready(out)
        ref = mhsa_reference(x, params, heads=heads, pos_emb=pos_emb)
        assert out.shape == (B, C, W, H)
        max_err = float(jnp.max(jnp.abs(out - ref)))
        # approx reciprocal in the softmax denominator loosens tolerance slightly
        assert jnp.allclose(out, ref, atol=5e-3, rtol=5e-3), max_err

    print("KERNEL_OK")
</pallas_src>

<mosaic_0001>
module attributes {stable_mosaic.version = 11 : i64} {
  func.func @_mhsa_kernel(%arg0: i32, %arg1: memref<1x32x64xf32, #tpu.memory_space<vmem>>, %arg2: memref<32x32xf32, #tpu.memory_space<vmem>>, %arg3: memref<32x1xf32, #tpu.memory_space<vmem>>, %arg4: memref<32x32xf32, #tpu.memory_space<vmem>>, %arg5: memref<32x1xf32, #tpu.memory_space<vmem>>, %arg6: memref<32x32xf32, #tpu.memory_space<vmem>>, %arg7: memref<32x1xf32, #tpu.memory_space<vmem>>, %arg8: memref<4x8x64xf32, #tpu.memory_space<vmem>>, %arg9: memref<1x32x64xf32, #tpu.memory_space<vmem>>, %arg10: memref<32x64xf32, #tpu.memory_space<vmem>>, %arg11: memref<32x64xf32, #tpu.memory_space<vmem>>, %arg12: memref<32x64xf32, #tpu.memory_space<vmem>>) attributes {dimension_semantics = [#tpu.dimension_semantics<parallel>], iteration_bounds = array<i64: 2>, scalar_prefetch = 0 : i64, scratch_operands = 3 : i64, tpu.core_type = #tpu.core_type<tc>, window_params = [{transform_indices = @transform_0, window_bounds = array<i64: 1, 32, 64>}, {pipeline_mode = #tpu.pipeline_mode<synchronous>, transform_indices = @transform_1, window_bounds = array<i64: 32, 32>}, {pipeline_mode = #tpu.pipeline_mode<synchronous>, transform_indices = @transform_2, window_bounds = array<i64: 32, 1>}, {pipeline_mode = #tpu.pipeline_mode<synchronous>, transform_indices = @transform_3, window_bounds = array<i64: 32, 32>}, {pipeline_mode = #tpu.pipeline_mode<synchronous>, transform_indices = @transform_4, window_bounds = array<i64: 32, 1>}, {pipeline_mode = #tpu.pipeline_mode<synchronous>, transform_indices = @transform_5, window_bounds = array<i64: 32, 32>}, {pipeline_mode = #tpu.pipeline_mode<synchronous>, transform_indices = @transform_6, window_bounds = array<i64: 32, 1>}, {pipeline_mode = #tpu.pipeline_mode<synchronous>, transform_indices = @transform_7, window_bounds = array<i64: 4, 8, 64>}, {transform_indices = @transform_8, window_bounds = array<i64: 1, 32, 64>}]} {
    %c0 = arith.constant 0 : index
    %c0_0 = arith.constant 0 : index
    %0 = vector.load %arg2[%c0, %c0_0] : memref<32x32xf32, #tpu.memory_space<vmem>>, vector<32x32xf32>
    %c0_1 = arith.constant 0 : index
    %c0_2 = arith.constant 0 : index
    %1 = vector.load %arg4[%c0_1, %c0_2] : memref<32x32xf32, #tpu.memory_space<vmem>>, vector<32x32xf32>
    %c0_3 = arith.constant 0 : index
    %c0_4 = arith.constant 0 : index
    %2 = vector.load %arg6[%c0_3, %c0_4] : memref<32x32xf32, #tpu.memory_space<vmem>>, vector<32x32xf32>
    %c0_5 = arith.constant 0 : index
    %c0_6 = arith.constant 0 : index
    %3 = vector.load %arg3[%c0_5, %c0_6] : memref<32x1xf32, #tpu.memory_space<vmem>>, vector<32x1xf32>
    %c0_7 = arith.constant 0 : index
    %c0_8 = arith.constant 0 : index
    %4 = vector.load %arg5[%c0_7, %c0_8] : memref<32x1xf32, #tpu.memory_space<vmem>>, vector<32x1xf32>
    %c0_9 = arith.constant 0 : index
    %c0_10 = arith.constant 0 : index
    %5 = vector.load %arg7[%c0_9, %c0_10] : memref<32x1xf32, #tpu.memory_space<vmem>>, vector<32x1xf32>
    %c0_i32 = arith.constant 0 : i32
    %6 = arith.index_cast %c0_i32 : i32 to index
    %c0_11 = arith.constant 0 : index
    %c0_12 = arith.constant 0 : index
    %7 = vector.load %arg1[%6, %c0_11, %c0_12] : memref<1x32x64xf32, #tpu.memory_space<vmem>>, vector<1x32x64xf32>
    %8 = vector.shape_cast %7 : vector<1x32x64xf32> to vector<32x64xf32>
    %cst = arith.constant dense<0.000000e+00> : vector<32x64xf32>
    %9 = tpu.matmul %0, %8, %cst {dimension_numbers = #tpu.dot_dimension_numbers<[1], [0], [0], [1], [0, 0, 1, 1], [], []>} : vector<32x32xf32>, vector<32x64xf32>, vector<32x64xf32> -> vector<32x64xf32>
    %10 = vector.broadcast %3 : vector<32x1xf32> to vector<32x64xf32>
    %11 = arith.addf %9, %10 : vector<32x64xf32>
    %c0_13 = arith.constant 0 : index
    %c0_14 = arith.constant 0 : index
    %12 = vector.load %arg10[%c0_13, %c0_14] : memref<32x64xf32, #tpu.memory_space<vmem>>, vector<32x64xf32>
    tpu.vector_store %arg10[%c0_13, %c0_14], %11 {strides = array<i32>} : memref<32x64xf32, #tpu.memory_space<vmem>>, vector<32x64xf32>,
    %cst_15 = arith.constant dense<0.000000e+00> : vector<32x64xf32>
    %13 = tpu.matmul %1, %8, %cst_15 {dimension_numbers = #tpu.dot_dimension_numbers<[1], [0], [0], [1], [0, 0, 1, 1], [], []>} : vector<32x32xf32>, vector<32x64xf32>, vector<32x64xf32> -> vector<32x64xf32>
    %14 = vector.broadcast %4 : vector<32x1xf32> to vector<32x64xf32>
    %15 = arith.addf %13, %14 : vector<32x64xf32>
    %c0_16 = arith.constant 0 : index
    %c0_17 = arith.constant 0 : index
    %16 = vector.load %arg11[%c0_16, %c0_17] : memref<32x64xf32, #tpu.memory_space<vmem>>, vector<32x64xf32>
    tpu.vector_store %arg11[%c0_16, %c0_17], %15 {strides = array<i32>} : memref<32x64xf32, #tpu.memory_space<vmem>>, vector<32x64xf32>,
    %cst_18 = arith.constant dense<0.000000e+00> : vector<32x64xf32>
    %17 = tpu.matmul %2, %8, %cst_18 {dimension_numbers = #tpu.dot_dimension_numbers<[1], [0], [0], [1], [0, 0, 1, 1], [], []>} : vector<32x32xf32>, vector<32x64xf32>, vector<32x64xf32> -> vector<32x64xf32>
    %18 = vector.broadcast %5 : vector<32x1xf32> to vector<32x64xf32>
    %19 = arith.addf %17, %18 : vector<32x64xf32>
    %c0_19 = arith.constant 0 : index
    %c0_20 = arith.constant 0 : index
    %20 = vector.load %arg12[%c0_19, %c0_20] : memref<32x64xf32, #tpu.memory_space<vmem>>, vector<32x64xf32>
    tpu.vector_store %arg12[%c0_19, %c0_20], %19 {strides = array<i32>} : memref<32x64xf32, #tpu.memory_space<vmem>>, vector<32x64xf32>,
    %c0_i32_21 = arith.constant 0 : i32
    %c4_i32 = arith.constant 4 : i32
    %21 = arith.addi %c0_i32_21, %c4_i32 : i32
    %c1_i32 = arith.constant 1 : i32
    scf.for %arg13 = %c0_i32_21 to %21 step %c1_i32  : i32 {
      %c8_i32 = arith.constant 8 : i32
      %22 = arith.muli %arg13, %c8_i32 : i32
      %23 = tpu.assume_multiple %22, 8 : i32
      %24 = arith.index_cast %23 : i32 to index
      %c0_24 = arith.constant 0 : index
      %25 = vector.load %arg10[%24, %c0_24] : memref<32x64xf32, #tpu.memory_space<vmem>>, vector<8x64xf32>
      %26 = arith.index_cast %23 : i32 to index
      %c0_25 = arith.constant 0 : index
      %27 = vector.load %arg11[%26, %c0_25] : memref<32x64xf32, #tpu.memory_space<vmem>>, vector<8x64xf32>
      %28 = arith.index_cast %23 : i32 to index
      %c0_26 = arith.constant 0 : index
      %29 = vector.load %arg12[%28, %c0_26] : memref<32x64xf32, #tpu.memory_space<vmem>>, vector<8x64xf32>
      %cst_27 = arith.constant dense<0.000000e+00> : vector<64x64xf32>
      %30 = tpu.matmul %25, %27, %cst_27 {dimension_numbers = #tpu.dot_dimension_numbers<[0], [0], [1], [1], [0, 1, 1, 1], [], []>} : vector<8x64xf32>, vector<8x64xf32>, vector<64x64xf32> -> vector<64x64xf32>
      %31 = arith.index_cast %arg13 : i32 to index
      %c0_28 = arith.constant 0 : index
      %c0_29 = arith.constant 0 : index
      %32 = vector.load %arg8[%31, %c0_28, %c0_29] : memref<4x8x64xf32, #tpu.memory_space<vmem>>, vector<1x8x64xf32>
      %33 = vector.shape_cast %32 : vector<1x8x64xf32> to vector<8x64xf32>
      %cst_30 = arith.constant dense<0.000000e+00> : vector<64x64xf32>
      %34 = tpu.matmul %33, %25, %cst_30 {dimension_numbers = #tpu.dot_dimension_numbers<[0], [0], [1], [1], [0, 1, 1, 1], [], []>} : vector<8x64xf32>, vector<8x64xf32>, vector<64x64xf32> -> vector<64x64xf32>
      %35 = arith.addf %30, %34 : vector<64x64xf32>
      %cst_31 = arith.constant dense<0xFF800000> : vector<64xf32>
      %36 = vector.multi_reduction <maximumf>, %35, %cst_31 [1] : vector<64x64xf32> to vector<64xf32>
      %37 = vector.shape_cast %36 : vector<64xf32> to vector<64x1xf32>
      %38 = vector.broadcast %37 : vector<64x1xf32> to vector<64x64xf32>
      %39 = arith.subf %35, %38 : vector<64x64xf32>
      %40 = math.exp %39 : vector<64x64xf32>
      %cst_32 = arith.constant dense<0.000000e+00> : vector<64xf32>
      %41 = vector.multi_reduction <add>, %40, %cst_32 [1] : vector<64x64xf32> to vector<64xf32>
      %42 = vector.shape_cast %41 : vector<64xf32> to vector<64x1xf32>
      %43 = tpu.reciprocal %42 {approx = true} : vector<64x1xf32> -> vector<64x1xf32>
      %44 = vector.broadcast %43 : vector<64x1xf32> to vector<64x64xf32>
      %45 = arith.mulf %40, %44 : vector<64x64xf32>
      %cst_33 = arith.constant dense<0.000000e+00> : vector<8x64xf32>
      %46 = tpu.matmul %29, %45, %cst_33 {dimension_numbers = #tpu.dot_dimension_numbers<[1], [1], [0], [0], [0, 0, 1, 0], [], []>} : vector<8x64xf32>, vector<64x64xf32>, vector<8x64xf32> -> vector<8x64xf32>
      %47 = arith.index_cast %c0_i32 : i32 to index
      %48 = arith.index_cast %23 : i32 to index
      %c0_34 = arith.constant 0 : index
      %49 = vector.load %arg9[%47, %48, %c0_34] : memref<1x32x64xf32, #tpu.memory_space<vmem>>, vector<1x8x64xf32>
      %50 = vector.shape_cast %49 : vector<1x8x64xf32> to vector<8x64xf32>
      %51 = vector.shape_cast %46 : vector<8x64xf32> to vector<1x8x64xf32>
      tpu.vector_store %arg9[%47, %48, %c0_34], %51 {strides = array<i32>} : memref<1x32x64xf32, #tpu.memory_space<vmem>>, vector<1x8x64xf32>,
    }
    %c4_i32_22 = arith.constant 4 : i32
    %c1_i32_23 = arith.constant 1 : i32
    return
  }
  func.func @transform_0(%arg0: i32) -> (i32, i32, i32) {
    %c0_i32 = arith.constant 0 : i32
    %c0_i32_0 = arith.constant 0 : i32
    %c0_i32_1 = arith.constant 0 : i32
    return %arg0, %c0_i32, %c0_i32_0 : i32, i32, i32
  }
  func.func @transform_1(%arg0: i32) -> (i32, i32) {
    %c0_i32 = arith.constant 0 : i32
    %c0_i32_0 = arith.constant 0 : i32
    %c0_i32_1 = arith.constant 0 : i32
    return %c0_i32, %c0_i32_0 : i32, i32
  }
  func.func @transform_2(%arg0: i32) -> (i32, i32) {
    %c0_i32 = arith.constant 0 : i32
    %c0_i32_0 = arith.constant 0 : i32
    %c0_i32_1 = arith.constant 0 : i32
    return %c0_i32, %c0_i32_0 : i32, i32
  }
  func.func @transform_3(%arg0: i32) -> (i32, i32) {
    %c0_i32 = arith.constant 0 : i32
    %c0_i32_0 = arith.constant 0 : i32
    %c0_i32_1 = arith.constant 0 : i32
    return %c0_i32, %c0_i32_0 : i32, i32
  }
  func.func @transform_4(%arg0: i32) -> (i32, i32) {
    %c0_i32 = arith.constant 0 : i32
    %c0_i32_0 = arith.constant 0 : i32
    %c0_i32_1 = arith.constant 0 : i32
    return %c0_i32, %c0_i32_0 : i32, i32
  }
  func.func @transform_5(%arg0: i32) -> (i32, i32) {
    %c0_i32 = arith.constant 0 : i32
    %c0_i32_0 = arith.constant 0 : i32
    %c0_i32_1 = arith.constant 0 : i32
    return %c0_i32, %c0_i32_0 : i32, i32
  }
  func.func @transform_6(%arg0: i32) -> (i32, i32) {
    %c0_i32 = arith.constant 0 : i32
    %c0_i32_0 = arith.constant 0 : i32
    %c0_i32_1 = arith.constant 0 : i32
    return %c0_i32, %c0_i32_0 : i32, i32
  }
  func.func @transform_7(%arg0: i32) -> (i32, i32, i32) {
    %c0_i32 = arith.constant 0 : i32
    %c0_i32_0 = arith.constant 0 : i32
    %c0_i32_1 = arith.constant 0 : i32
    %c0_i32_2 = arith.constant 0 : i32
    return %c0_i32, %c0_i32_0, %c0_i32_1 : i32, i32, i32
  }
  func.func @transform_8(%arg0: i32) -> (i32, i32, i32) {
    %c0_i32 = arith.constant 0 : i32
    %c0_i32_0 = arith.constant 0 : i32
    %c0_i32_1 = arith.constant 0 : i32
    return %arg0, %c0_i32, %c0_i32_0 : i32, i32, i32
  }
}

</mosaic_0001>

<bundles_post_ra>
// kernel: tpu_custom_call.1
= control target key start
LH: loop header
LB: loop body
LE: loop exit
PB: predicated region body
PF: predicated region fallthrough
CT: control target
= control target key end

     0   :  { %s1736_s0 = inlined_call_operand.vmem [shape: f32[2,32,64], index: 0, kind: input, shape index: {}]   ;;  %s1737_s1 = inlined_call_operand.vmem [shape: f32[32,32], index: 1, kind: input, shape index: {}]   ;;  %s1738_s2 = inlined_call_operand.vmem [shape: f32[32,1], index: 2, kind: input, shape index: {}]   ;;  %s1739_s3 = inlined_call_operand.hbm [shape: f32[32,32], index: 3, kind: input, shape index: {}]   ;;  %s1740_s4 = inlined_call_operand.vmem [shape: f32[32,1], index: 4, kind: input, shape index: {}]   ;;  %s1741_s5 = inlined_call_operand.hbm [shape: f32[32,32], index: 5, kind: input, shape index: {}]   ;;  %s1742_s6 = inlined_call_operand.vmem [shape: f32[32,1], index: 6, kind: input, shape index: {}]   ;;  %s1743_s7 = inlined_call_operand.hbm [shape: f32[4,8,64], index: 7, kind: input, shape index: {}]   ;;  %s1744_s8 = inlined_call_operand.hbm [shape: f32[2,32,64], index: 8, kind: output, shape index: {}]  }
   0x1   :  { %1745 = sst [smem:[#allocation15_spill]] %s1739_s3 }
   0x2   :  { %1746 = sst [smem:[#allocation16_spill]] %s1741_s5 }
   0x3   :  { %13 = vsyncpa [#allocation6], 0 }
   0x4   :  { %14 = vsyncpa [#allocation9], 0 }
   0x5   :  { %15 = vsyncpa [#allocation7], 0 }
   0x6   :  { %17 = vsyncpa [#allocation7 + $0x1], 0  ;;  %s1464_s27 = smov 0   ;;  %s1466_s28 = smov 0  }
   0x7   :  { %s1468_s29 = smov 0   ;;  %s1470_s30 = smov 0  }
   0x8 LB: > { %s1485_s9 = sadd.s32 4294967295, %s1405_s30   ;;  %s1050_s10 = sadd.s32 4294967294, %s1405_s30   ;;  %s1405_s30 = sphi %s1470_s30, %s1756_s30   ;;  %s1401_s29 = sphi %s1468_s29, %s1755_s29   ;;  %s1397_s28 = sphi %s1466_s28, %s1754_s28   ;;  %s1393_s27 = sphi %s1464_s27, %s1753_s27  }
   0x9   : > { %s1489_s11 = sadd.s32 1, %s1405_s30   ;;  %s203_s12 = sadd.s32 1, %s1401_s29 }
   0xa   : > { %s200_s13 = ssub.s32 %s1405_s30, %s1489_s11  ;;  %p213_p0 = scmp.ne.s32.totalorder %s1401_s29, %s1397_s28 }
   0xb   : > { %p201_p1 = scmp.eq.s32.totalorder %s200_s13, 0  ;;  %p214_p2 = scmp.eq.s32.totalorder %s1485_s9, 1 }
   0xc   : > { %p219_p3 = scmp.ne.s32.totalorder %s1397_s28, %s1393_s27  ;;  %p220_p4 = scmp.eq.s32.totalorder %s1050_s10, 1 }
   0xd   : > { %s1500_s14 = scalar_select %p201_p1, %s1401_s29, %s203_s12  }
   0xe   : > { %p1502_p5 = por %p214_p2, %p213_p0  ;;  %p1506_p6 = por %p220_p4, %p219_p3 }
   0xf   : > { %p1051_p7 = scmp.ge.s32.totalorder %s1405_s30, 1  ;;  %p227_p8 = scmp.lt.s32.totalorder %s1405_s30, 3 }
  0x10   : > { %p1150_p9 = scmp.eq.s32.totalorder %s1485_s9, 0  ;;  %s1750_s5 = sld [smem:[#allocation16_spill]] }
  0x11   : > { %p1513_p10 = pnand %p1051_p7, %p227_p8  ;;  %s1751_s3 = sld [smem:[#allocation15_spill]] }
  0x12   : > { %s1411_s25 = smov [#allocation8]   ;;  %s1412_s10 = smov 128  }
  0x13   : > { %p1136_p11 = pneg %p1513_p10  ;;  %s263_s26 = sshll.u32 %s1411_s25, 4  ;;  %s264_s26 = int_to_ptr.vmem [resolvable:$true] %s263_s26 }
  0x14   : > { %s1413_s12 = smov 8   ;;  %s1414_s13 = smov [#allocation5]  }
  0x15   : > { %p1527_p12 = pnand %p1150_p9, %p1136_p11  ;;  %s246_s18 = sshll.u32 %s1414_s13, 4  ;;  %s247_s18 = int_to_ptr.vmem [resolvable:$true] %s246_s18 }
  0x16   : > { %s261_s20 = sshll.u32 %s1750_s5, 4  ;;  %s278_s22 = sshll.u32 %s1743_s7, 4  ;;  %s262_s20 = int_to_ptr.hbm [resolvable:$true] %s261_s20  ;;  %s279_s22 = int_to_ptr.hbm [resolvable:$true] %s278_s22 }
  0x17   : > { %s244_s23 = sshll.u32 %s1751_s3, 4  ;;  %s1415_s3 = smov [#allocation10]   ;;  %s245_s23 = int_to_ptr.hbm [resolvable:$true] %s244_s23 }
  0x18   : > { %1142 = dma.hbm_to_vmem [thread:$0]  (!%p1527_p12), %s262_s20, 512, %s264_s26, [#allocation9], %s1412_s10, %s1412_s10, %s1413_s12  }
  0x19   : > { %1139 = dma.hbm_to_vmem [thread:$0]  (!%p1527_p12), %s245_s23, 512, %s247_s18, [#allocation6], %s1412_s10, %s1412_s10, %s1413_s12  }
  0x1a   : > { %s280_s5 = sshll.u32 %s1415_s3, 4  ;;  %304 = sbr.rel (%p1513_p10) target bundleno = 1049 (0x419), region = 52  ;;  %s281_s5 = int_to_ptr.vmem [resolvable:$true] %s280_s5 }
  0x1b   : > { %1145 = dma.hbm_to_vmem [thread:$0]  (!%p1527_p12), %s279_s22, 512, %s281_s5, [#allocation9], %s1412_s10, %s1412_s10, %s1413_s12  }
  0x1f   : > { %1380 = dma.done.wait (%p1150_p9), [#allocation6], 512  }
  0x20   : > { %1382 = vsyncadd (%p1150_p9), [#allocation6], 4294966784 }
  0x21   : > { %1384 = dma.done.wait (%p1150_p9), [#allocation9], 1024  }
  0x22   : > { %1386 = vsyncadd (%p1150_p9), [#allocation9], 4294966272  ;;  %s346_s3 = sand.u32 1, %s1397_s28   ;;  %p349_p13 = scmp.lt.s32.totalorder %s1485_s9, 1  ;;  %v1416_v0 = vmov 0   ;;  %v368_v2 = vld [vmem:[%s1738_s2 + $0x10] sm:$0xff] }
  0x23   : > { %1207 = vset.pattern.permute.xlu1 %v1416_v0  ;;  %1206 = vset.pattern.permute.xlu0 %v1416_v0  ;;  %s1554_s5 = sshll.u32 %s346_s3, 5  ;;  %v366_v3 = vld [vmem:[%s1738_s2] sm:$0xff]  ;;  %vm402_vm0 = vcmask 261120   ;;  %v355_v8 = vld [vmem:[%s1737_s1 + $0x8] sm:$0xff]  ;;  %v369_v11 = vld [vmem:[%s1738_s2 + $0x18] sm:$0xff]  ;;  %vm444_vm1 = vcmask 523264  }
  0x24   : > { %1208 = vset.pattern.permute.xlu2 %v1416_v0  ;;  %s350_s17 = scalar_select %p349_p13, %s1485_s9, 1  ;;  %394 = vperm.xlu1 %1207, %v368_v2   ;;  %v354_v7 = vld [vmem:[%s1737_s1] sm:$0xff]  ;;  %v359_v9 = vld [vmem:[#allocation5 + $0x8] sm:$0xff]  ;;  %v356_v14 = vld [vmem:[%s1737_s1 + $0x10] sm:$0xff] }
  0x25   : > { %384 = vperm.xlu0 %1206, %v366_v3   ;;  %v363_v10 = vld [vmem:[#allocation8 + $0x8] sm:$0xff]  ;;  %v370_v13 = vld [vmem:[%s1740_s4] sm:$0xff]  ;;  %v360_v16 = vld [vmem:[#allocation5 + $0x10] sm:$0xff]  ;;  %s348_s21 = scalar_lea.vmem [#allocation11], %s1554_s5  ;;  %s1633_s22 = smov 0  }
  0x26   : > { %s1106_s20 = sshll.u32 %s350_s17, 5  ;;  %v367_v12 = vld [vmem:[%s1738_s2 + $0x8] sm:$0xff]  ;;  %451 = vperm.xlu2 %1208, %v370_v13   ;;  %v358_v15 = vld [vmem:[#allocation5] sm:$0xff]  ;;  %v364_v17 = vld [vmem:[#allocation8 + $0x10] sm:$0xff] }
  0x27   : > { %s353_s25 = scalar_lea.vmem %s1736_s0, %s1106_s20  ;;  %v373_v18 = vld [vmem:[%s1740_s4 + $0x18] sm:$0xff]  ;;  %v372_v19 = vld [vmem:[%s1740_s4 + $0x10] sm:$0xff]  ;;  %v371_v20 = vld [vmem:[%s1740_s4 + $0x8] sm:$0xff] }
  0x28   : > { %v381_v1 = vld [vmem:[%s353_s25 + $0x18] sm:$0xff]  ;;  %v380_v4 = vld [vmem:[%s353_s25 + $0x10] sm:$0xff]  ;;  %v379_v5 = vld [vmem:[%s353_s25 + $0x8] sm:$0xff] }
  0x29   : > { %427 = vmatpush.msra.mxu0 %v381_v1  ;;  %1108 = vmatpush.msra.mxu3 %v381_v1  ;;  %v378_v6 = vld [vmem:[%s353_s25] sm:$0xff]  ;;  %v357_v21 = vld [vmem:[%s1737_s1 + $0x18] sm:$0xff]  ;;  %v376_v25 = vld [vmem:[%s1742_s6 + $0x10] sm:$0xff] }
  0x2a   : > { %1112 = vmatpush.msra.mxu1 %v381_v1  ;;  %1116 = vmatpush.msra.mxu2 %v381_v1  ;;  %v361_v22 = vld [vmem:[#allocation5 + $0x18] sm:$0xff]  ;;  %v362_v23 = vld [vmem:[#allocation8] sm:$0xff]  ;;  %v375_v26 = vld [vmem:[%s1742_s6 + $0x8] sm:$0xff] }
  0x2b   : > { %428 = vmatpush.msra.mxu0 %v380_v4  ;;  %1109 = vmatpush.msra.mxu3 %v380_v4  ;;  %v365_v24 = vld [vmem:[#allocation8 + $0x18] sm:$0xff]  ;;  %v374_v27 = vld [vmem:[%s1742_s6] sm:$0xff] }
  0x2c   : > { %1113 = vmatpush.msra.mxu1 %v380_v4  ;;  %1117 = vmatpush.msra.mxu2 %v380_v4  ;;  %v377_v28 = vld [vmem:[%s1742_s6 + $0x18] sm:$0xff] }
  0x2d   : > { %429 = vmatpush.msra.mxu0 %v379_v5  ;;  %1110 = vmatpush.msra.mxu3 %v379_v5 }
  0x2e   : > { %1114 = vmatpush.msra.mxu1 %v379_v5  ;;  %1118 = vmatpush.msra.mxu2 %v379_v5 }
  0x2f   : > { %430 = vmatpush.msra.mxu0 %v378_v6  ;;  %1111 = vmatpush.msra.mxu3 %v378_v6 }
  0x30   : > { %1115 = vmatpush.msra.mxu1 %v378_v6  ;;  %1119 = vmatpush.msra.mxu2 %v378_v6 }
  0x31   : > { %1063 = vmatmul.msk.f32.vlgmr.msra.gmra.mxu0 %vm402_vm0, %v354_v7  ;;  %1064 = vmatmul.msk.f32.vlgmr.msra.gmra.mxu3 %vm402_vm0, %v355_v8 }
  0x32   : > { %1068 = vmatmul.msk.f32.vlgmr.msra.gmra.mxu1 %vm402_vm0, %v359_v9  ;;  %1072 = vmatmul.msk.f32.vlgmr.msra.gmra.mxu2 %vm402_vm0, %v363_v10 }
  0x33   : > { %493 = vmatpush.msrb.mxu0 %v381_v1  ;;  %399 = vperm.xlu1 %1207, %v369_v11  }
  0x34   : > { %389 = vperm.xlu0 %1206, %v367_v12   ;;  %456 = vperm.xlu2 %1208, %v371_v20  }
  0x35   : > { %494 = vmatpush.msrb.mxu0 %v380_v4 }
  0x37   : > { %495 = vmatpush.msrb.mxu0 %v379_v5 }
  0x39   : > { %496 = vmatpush.msrb.mxu0 %v378_v6  ;;  %1065 = vmatmul.msk.f32.gmra.mxu3 %vm402_vm0, %v356_v14 }
  0x3a   : > { %1067 = vmatmul.msk.f32.vlgmr.msrb.gmra.mxu0 %vm402_vm0, %v358_v15  ;;  %1069 = vmatmul.msk.f32.gmra.mxu1 %vm402_vm0, %v360_v16 }
  0x3b   : > { %1073 = vmatmul.msk.f32.gmra.mxu2 %vm402_vm0, %v364_v17  ;;  %466 = vperm.xlu1 %1207, %v373_v18  }
  0x3c   : > { %461 = vperm.xlu0 %1206, %v372_v19   ;;  %558 = vmatpush.msra.mxu0 %v381_v1 }
  0x3d   : > { %516 = vperm.xlu2 %1208, %v374_v27  }
  0x3e   : > { %559 = vmatpush.msra.mxu0 %v380_v4 }
  0x40   : > { %560 = vmatpush.msra.mxu0 %v379_v5 }
  0x41   : > { %1066 = vmatmul.msk.f32.gmra.mxu3 %vm402_vm0, %v357_v21 }
  0x42   : > { %561 = vmatpush.msra.mxu0 %v378_v6  ;;  %1070 = vmatmul.msk.f32.gmra.mxu1 %vm402_vm0, %v361_v22 }
  0x43   : > { %1071 = vmatmul.msk.f32.vlgmr.msra.gmra.mxu0 %vm402_vm0, %v362_v23  ;;  %1074 = vmatmul.msk.f32.gmra.mxu2 %vm402_vm0, %v365_v24 }
  0x44   : > { %526 = vperm.xlu1 %1207, %v376_v25   ;;  %521 = vperm.xlu0 %1206, %v375_v26  }
  0x45   : > { %531 = vperm.xlu2 %1208, %v377_v28  }
  0x80   : > { %v452_v31 = vpop.permute.xlu2 %451 }
  0x8e   : > { %v457_v36 = vpop.permute.xlu2 %456 }
  0x96   : > { %v395_v30 = vpop.permute.xlu1 %394 }
  0x97   : > { %v385_v29 = vpop.permute.xlu0 %384  ;;  %v517_v50 = vpop.permute.xlu2 %516 }
  0x9f   : > { %v532_v62 = vpop.permute.xlu2 %531 }
  0xa5   : > { %v400_v33 = vpop.permute.xlu1 %399 }
  0xa6   : > { %v390_v32 = vpop.permute.xlu0 %389 }
  0xad   : > { %v467_v40 = vpop.permute.xlu1 %466 }
  0xae   : > { %v462_v34 = vpop.permute.xlu0 %461  ;;  %v432_v35 = vpop.f32.mrf.mxu0 }
  0xaf   : > { %v433_v37 = vadd.f32 %v432_v35, %v385_v29  ;;  %v501_v38 = vpop.f32.mrf.mxu1 }
  0xb0   : > { %v502_v39 = vadd.f32 %v501_v38, %v457_v36 }
  0xb1   : > { %445 = vst.msk [vmem:[#allocation2] sm:$0xff] %vm444_vm1, %v433_v37 }
  0xb2   : > { %511 = vst.msk [vmem:[#allocation3 + $0x8] sm:$0xff] %vm444_vm1, %v502_v39 }
  0xb4   : > { %v435_v41 = vpop.f32.mrf.mxu3 }
  0xb5   : > { %v436_v42 = vadd.f32 %v435_v41, %v390_v32  ;;  %v566_v43 = vpop.f32.mrf.mxu2 }
  0xb6   : > { %v522_v44 = vpop.permute.xlu0 %521  ;;  %v527_v53 = vpop.permute.xlu1 %526 }
  0xb7   : > { %446 = vst.msk [vmem:[#allocation2 + $0x8] sm:$0xff] %vm444_vm1, %v436_v42  ;;  %v567_v45 = vadd.f32 %v566_v43, %v522_v44  ;;  %v498_v46 = vpop.f32.mrf.mxu0  ;;  %v504_v47 = vpop.f32.mrf.mxu1 }
  0xb8   : > { %v499_v48 = vadd.f32 %v498_v46, %v452_v31  ;;  %v505_v49 = vadd.f32 %v504_v47, %v462_v34 }
  0xb9   : > { %576 = vst.msk [vmem:[#allocation4 + $0x8] sm:$0xff] %vm444_vm1, %v567_v45 }
  0xba   : > { %510 = vst.msk [vmem:[#allocation3] sm:$0xff] %vm444_vm1, %v499_v48 }
  0xbb   : > { %512 = vst.msk [vmem:[#allocation3 + $0x10] sm:$0xff] %vm444_vm1, %v505_v49 }
  0xbc   : > { %v438_v51 = vpop.f32.mrf.mxu3 }
  0xbd   : > { %v439_v52 = vadd.f32 %v438_v51, %v395_v30 }
  0xbe   : > { %v569_v54 = vpop.f32.mrf.mxu2 }
  0xbf   : > { %447 = vst.msk [vmem:[#allocation2 + $0x10] sm:$0xff] %vm444_vm1, %v439_v52  ;;  %v570_v55 = vadd.f32 %v569_v54, %v527_v53  ;;  %v507_v56 = vpop.f32.mrf.mxu1 }
  0xc0   : > { %v508_v57 = vadd.f32 %v507_v56, %v467_v40  ;;  %v563_v58 = vpop.f32.mrf.mxu0 }
  0xc1   : > { %577 = vst.msk [vmem:[#allocation4 + $0x10] sm:$0xff] %vm444_vm1, %v570_v55  ;;  %v564_v59 = vadd.f32 %v563_v58, %v517_v50 }
  0xc2   : > { %513 = vst.msk [vmem:[#allocation3 + $0x18] sm:$0xff] %vm444_vm1, %v508_v57 }
  0xc3   : > { %575 = vst.msk [vmem:[#allocation4] sm:$0xff] %vm444_vm1, %v564_v59 }
  0xc4   : > { %v441_v60 = vpop.f32.mrf.mxu3 }
  0xc5   : > { %v442_v61 = vadd.f32 %v441_v60, %v400_v33 }
  0xc6   : > { %v572_v63 = vpop.f32.mrf.mxu2 }
  0xc7   : > { %448 = vst.msk [vmem:[#allocation2 + $0x18] sm:$0xff] %vm444_vm1, %v442_v61  ;;  %v573_v0 = vadd.f32 %v572_v63, %v532_v62 }
  0xc9   : > { %578 = vst.msk [vmem:[#allocation4 + $0x18] sm:$0xff] %vm444_vm1, %v573_v0 }
  0xca LB: >> { %s1639_s17 = sshll.u32 %s1409_s22, 3  ;;  %vm626_vm2 = vcmask 64512   ;;  %s584_s22 = sadd.s32 1, %s1409_s22   ;;  %s1409_s22 = sphi %s1633_s22, %s584_s22  }
  0xcb   : >> { %s592_s20 = scalar_lea.vmem [#allocation10], %s1639_s17  ;;  %s586_s23 = scalar_lea.vmem [#allocation2], %s1639_s17 }
  0xcc   : >> { %v593_v1 = vld [vmem:[%s592_s20] sm:$0xff]  ;;  %s588_s24 = scalar_lea.vmem [#allocation3], %s1639_s17  ;;  %s590_s25 = scalar_lea.vmem [#allocation4], %s1639_s17 }
  0xcd   : >> { %594 = vxpose.xlu0.b32.start.end [1/1] (short) (narrow) %v593_v1, 64  ;;  %v589_v7 = vld [vmem:[%s588_s24] sm:$0xff]  ;;  %s924_s26 = scalar_lea.vmem %s348_s21, %s1639_s17 [#allocation11]  ;;  %p581_p0 = scmp.ge.s32.totalorder %s584_s22, 4  }
  0xce   : >> { %v587_v2 = vld [vmem:[%s586_s23] sm:$0xff]  ;;  %763 = vmatpush.msra.mxu1 %v589_v7  ;;  %s1107_s10 = sshll.u32 (%p581_p0), %s1485_s9, 5  ;;  %s939_s19 = sshll.u32 (%p581_p0), %s348_s21, 4  ;;  %s940_s19 = int_to_ptr.vmem [resolvable:$true] %s939_s19 }
  0xcf   : >> { %666 = vmatpush.msra.mxu0 %v587_v2  ;;  %1120 = vmatpush.msra.mxu3 %v587_v2  ;;  %s938_s18 = scalar_lea.hbm (%p581_p0), %s1744_s8, %s1107_s10  ;;  %s927_s20 = scalar_lea.sflag (%p581_p0), [#allocation7], %s346_s3 }
  0xd0   : > { %s941_s17 = sshll.u32 (%p581_p0), %s938_s18, 4  ;;  %s942_s17 = int_to_ptr.hbm [resolvable:$true] %s941_s17 }
  0xd1   : >> { %1121 = vmatpush.msrb.mxu3 %v589_v7  ;;  %s1345_s23 = sshra.s32 (%p581_p0), %s942_s17, 4  ;;  %s1346_s23 = int_to_ptr.hbm [resolvable:$true] %s1345_s23 }
  0xd2   : > { %s1347_s22 = scalar_lea.hbm (%p581_p0), %s1346_s23, 32  ;;  %p1352_p4 = scmp.lt.s32.totalorder (%p581_p0), %s1346_s23, %s1744_s8 }
  0xd3   : > { %p1348_p1 = scmp.ne.s32.totalorder (%p581_p0), %s1346_s23, %s1347_s22 }
  0xd5   : > { %p1349_p2 = pnand (%p581_p0), %p1348_p1, %p1502_p5 }
  0xd7   : > { %p1350_p3 = pneg (%p581_p0), %p1349_p2 }
 0x10d   : >> { %692 = vxpose.xlu0.b32.start.end [1/1] (short) (narrow) %v587_v2, 64 }
 0x171   : >> { %v610_v3 = vpop.trf.xlu0 }
 0x172   : >> { %1076 = vmatmul.msk.f32.vlgmr.msra.gmra.mxu0 %vm626_vm2, %v610_v3 }
 0x179   : >> { %v611_v4 = vpop.trf.xlu0 }
 0x17a   : >> { %1077 = vmatmul.msk.f32.gmra.mxu0 %vm626_vm2, %v611_v4 }
 0x181   : >> { %v612_v5 = vpop.trf.xlu0 }
 0x182   : >> { %1078 = vmatmul.msk.f32.gmra.mxu0 %vm626_vm2, %v612_v5 }
 0x189   : >> { %v613_v6 = vpop.trf.xlu0 }
 0x18a   : >> { %1079 = vmatmul.msk.f32.gmra.mxu0 %vm626_vm2, %v613_v6 }
 0x191   : >> { %v614_v8 = vpop.trf.xlu0 }
 0x192   : >> { %1080 = vmatmul.msk.f32.gmra.mxu0 %vm626_vm2, %v614_v8 }
 0x199   : >> { %v615_v9 = vpop.trf.xlu0 }
 0x19a   : >> { %1081 = vmatmul.msk.f32.gmra.mxu0 %vm626_vm2, %v615_v9 }
 0x1a1   : >> { %v616_v10 = vpop.trf.xlu0 }
 0x1a2   : >> { %1082 = vmatmul.msk.f32.vlgmr.msra.gmra.mxu3 %vm626_vm2, %v616_v10 }
 0x1a9   : >> { %v617_v11 = vpop.trf.xlu0 }
 0x1aa   : >> { %1083 = vmatmul.msk.f32.gmra.mxu3 %vm626_vm2, %v617_v11 }
 0x1b1   : >> { %v708_v12 = vpop.trf.xlu0 }
 0x1b2   : >> { %1084 = vmatmul.msk.f32.vlgmr.msra.gmra.mxu1 %vm626_vm2, %v708_v12 }
 0x1b9   : >> { %v709_v13 = vpop.trf.xlu0 }
 0x1ba   : >> { %1085 = vmatmul.msk.f32.gmra.mxu1 %vm626_vm2, %v709_v13 }
 0x1c1   : >> { %v710_v14 = vpop.trf.xlu0 }
 0x1c2   : >> { %1086 = vmatmul.msk.f32.gmra.mxu1 %vm626_vm2, %v710_v14 }
 0x1c9   : >> { %v711_v15 = vpop.trf.xlu0 }
 0x1ca   : >> { %1087 = vmatmul.msk.f32.gmra.mxu1 %vm626_vm2, %v711_v15 }
 0x1d1   : >> { %v712_v16 = vpop.trf.xlu0 }
 0x1d2   : >> { %1088 = vmatmul.msk.f32.gmra.mxu1 %vm626_vm2, %v712_v16 }
 0x1d9   : >> { %v713_v17 = vpop.trf.xlu0 }
 0x1da   : >> { %1089 = vmatmul.msk.f32.gmra.mxu1 %vm626_vm2, %v713_v17 }
 0x1e1   : >> { %v714_v18 = vpop.trf.xlu0 }
 0x1e2   : >> { %1090 = vmatmul.msk.f32.vlgmr.msrb.gmra.mxu3 %vm626_vm2, %v714_v18 }
 0x1e9   : >> { %v715_v19 = vpop.trf.xlu0 }
 0x1ea   : >> { %1091 = vmatmul.msk.f32.gmra.mxu3 %vm626_vm2, %v715_v19 }
 0x1ef   : >> { %v668_v20 = vpop.f32.mrf.mxu0 }
 0x1f7   : >> { %v671_v21 = vpop.f32.mrf.mxu0 }
 0x1ff   : >> { %v674_v26 = vpop.f32.mrf.mxu0 }
 0x207   : >> { %v677_v28 = vpop.f32.mrf.mxu0 }
 0x20f   : >> { %v680_v30 = vpop.f32.mrf.mxu0 }
 0x217   : >> { %v683_v33 = vpop.f32.mrf.mxu0 }
 0x225   : >> { %v686_v32 = vpop.f32.mrf.mxu3 }
 0x22d   : >> { %v689_v37 = vpop.f32.mrf.mxu3 }
 0x22f   : >> { %v765_v22 = vpop.f32.mrf.mxu1 }
 0x230   : >> { %v1660_v23 = vadd.f32 %v765_v22, %v668_v20 }
 0x232   : >> { %v789_v46 = vsel %vm444_vm1, %v1660_v23, -inf }
 0x237   : >> { %v768_v24 = vpop.f32.mrf.mxu1 }
 0x238   : >> { %v1662_v25 = vadd.f32 %v768_v24, %v671_v21 }
 0x23a   : >> { %v792_v51 = vsel %vm444_vm1, %v1662_v25, -inf }
 0x23f   : >> { %v771_v27 = vpop.f32.mrf.mxu1 }
 0x240   : >> { %v772_v41 = vadd.f32 %v771_v27, %v674_v26 }
 0x242   : >> { %v795_v42 = vsel %vm444_vm1, %v772_v41, -inf }
 0x247   : >> { %v774_v29 = vpop.f32.mrf.mxu1 }
 0x248   : >> { %v775_v49 = vadd.f32 %v774_v29, %v677_v28 }
 0x24a   : >> { %v798_v50 = vsel %vm444_vm1, %v775_v49, -inf }
 0x24f   : >> { %v777_v31 = vpop.f32.mrf.mxu1 }
 0x250   : >> { %v778_v38 = vadd.f32 %v777_v31, %v680_v30 }
 0x252   : >> { %v801_v39 = vsel %vm444_vm1, %v778_v38, -inf }
 0x257   : >> { %v780_v34 = vpop.f32.mrf.mxu1 }
 0x258   : >> { %v781_v35 = vadd.f32 %v780_v34, %v683_v33 }
 0x25a   : >> { %v804_v36 = vsel %vm444_vm1, %v781_v35, -inf }
 0x25b   : >> { %805 = vmax.xlane.f32.xlu2 %v804_v36 }
 0x263   : >> { %802 = vmax.xlane.f32.xlu2 %v801_v39 }
 0x265   : >> { %v783_v40 = vpop.f32.mrf.mxu3 }
 0x266   : >> { %v784_v47 = vadd.f32 %v783_v40, %v686_v32 }
 0x268   : >> { %v807_v48 = vsel %vm444_vm1, %v784_v47, -inf }
 0x26b   : >> { %796 = vmax.xlane.f32.xlu2 %v795_v42 }
 0x26d   : >> { %v786_v43 = vpop.f32.mrf.mxu3 }
 0x26e   : >> { %v787_v44 = vadd.f32 %v786_v43, %v689_v37 }
 0x270   : >> { %v810_v45 = vsel %vm444_vm1, %v787_v44, -inf }
 0x271   : >> { %811 = vmax.xlane.f32.xlu1 %v810_v45 }
 0x273   : >> { %790 = vmax.xlane.f32.xlu2 %v789_v46 }
 0x279   : >> { %808 = vmax.xlane.f32.xlu1 %v807_v48 }
 0x281   : >> { %799 = vmax.xlane.f32.xlu1 %v798_v50 }
 0x289   : >> { %793 = vmax.xlane.f32.xlu1 %v792_v51 }
 0x2ce   : >> { %v806_v52 = vpop.xlane.xlu2 %805 }
 0x2cf   : >> { %v818_v55 = vsub.f32 %v781_v35, %v806_v52  ;;  %v591_v52 = vld [vmem:[%s590_s25] sm:$0xff]  ;;  %s1351_s25 = scalar_lea.hbm (%p581_p0), %s1744_s8, 64 }
 0x2d0   : > { %p1353_p7 = scmp.lt.s32.totalorder (%p581_p0), %s1351_s25, %s1347_s22 }
 0x2d1   : >> { %v831_v58 = vmul.f32 1.442695, %v818_v55 }
 0x2d2   : > { %p1354_p8 = por (%p581_p0), %p1353_p7, %p1352_p4 }
 0x2d4   : > { %p1355_p9 = pnand (%p581_p0), %p1354_p8, %p1350_p3 }
 0x2d6   : >> { %v803_v57 = vpop.xlane.xlu2 %802 }
 0x2d7   : >> { %v817_v62 = vsub.f32 %v778_v38, %v803_v57 }
 0x2d9   : >> { %v829_v2 = vmul.f32 1.442695, %v817_v62 }
 0x2de   : >> { %v797_v1 = vpop.xlane.xlu2 %796 }
 0x2df   : >> { %v815_v7 = vsub.f32 %v772_v41, %v797_v1 }
 0x2e1   : >> { %v825_v11 = vmul.f32 1.442695, %v815_v7 }
 0x2e4   : >> { %v812_v53 = vpop.xlane.xlu1 %811 }
 0x2e5   : >> { %v820_v54 = vsub.f32 %v787_v44, %v812_v53 }
 0x2e6   : >> { %v791_v12 = vpop.xlane.xlu2 %790 }
 0x2e7   : >> { %v835_v56 = vmul.f32 1.442695, %v820_v54  ;;  %v813_v17 = vsub.f32 %v1660_v23, %v791_v12 }
 0x2e9   : >> { %1209 = vpow2.f32 %v835_v56  ;;  %v821_v21 = vmul.f32 1.442695, %v813_v17 }
 0x2ea   : >> { %1211 = vpow2.f32 %v831_v58 }
 0x2ec   : >> { %v809_v59 = vpop.xlane.xlu1 %808 }
 0x2ed   : >> { %v819_v60 = vsub.f32 %v784_v47, %v809_v59 }
 0x2ef   : >> { %v1210_v61 = vpop.eup %1209  ;;  %v833_v63 = vmul.f32 1.442695, %v819_v60 }
 0x2f0   : >> { %v858_v0 = vsel %vm444_vm1, %v1210_v61, 0.0  ;;  %v1212_v4 = vpop.eup %1211 }
 0x2f1   : >> { %1213 = vpow2.f32 %v833_v63  ;;  %859 = vadd.xlane.f32.xlu1 %v858_v0  ;;  %v852_v10 = vsel %vm444_vm1, %v1212_v4, 0.0 }
 0x2f2   : >> { %1215 = vpow2.f32 %v829_v2 }
 0x2f4   : >> { %v800_v3 = vpop.xlane.xlu1 %799 }
 0x2f5   : >> { %v816_v5 = vsub.f32 %v775_v49, %v800_v3 }
 0x2f7   : >> { %v1214_v6 = vpop.eup %1213  ;;  %v827_v8 = vmul.f32 1.442695, %v816_v5 }
 0x2f8   : >> { %v855_v9 = vsel %vm444_vm1, %v1214_v6, 0.0  ;;  %v1216_v14 = vpop.eup %1215 }
 0x2f9   : >> { %1217 = vpow2.f32 %v827_v8  ;;  %856 = vadd.xlane.f32.xlu2 %v855_v9  ;;  %853 = vadd.xlane.f32.xlu1 %v852_v10  ;;  %v849_v20 = vsel %vm444_vm1, %v1216_v14, 0.0 }
 0x2fa   : >> { %1219 = vpow2.f32 %v825_v11 }
 0x2fc   : >> { %v794_v13 = vpop.xlane.xlu1 %793 }
 0x2fd   : >> { %v814_v15 = vsub.f32 %v1662_v25, %v794_v13 }
 0x2ff   : >> { %v1218_v16 = vpop.eup %1217  ;;  %v823_v18 = vmul.f32 1.442695, %v814_v15 }
 0x300   : >> { %v846_v19 = vsel %vm444_vm1, %v1218_v16, 0.0  ;;  %v1220_v22 = vpop.eup %1219 }
 0x301   : >> { %1221 = vpow2.f32 %v823_v18  ;;  %847 = vadd.xlane.f32.xlu1 %v846_v19  ;;  %850 = vadd.xlane.f32.xlu2 %v849_v20  ;;  %v843_v25 = vsel %vm444_vm1, %v1220_v22, 0.0 }
 0x302   : >> { %1223 = vpow2.f32 %v821_v21 }
 0x307   : >> { %v1222_v24 = vpop.eup %1221 }
 0x308   : >> { %v840_v26 = vsel %vm444_vm1, %v1222_v24, 0.0  ;;  %v1224_v27 = vpop.eup %1223 }
 0x309   : >> { %841 = vadd.xlane.f32.xlu1 %v840_v26  ;;  %844 = vadd.xlane.f32.xlu2 %v843_v25  ;;  %v837_v23 = vsel %vm444_vm1, %v1224_v27, 0.0 }
 0x311   : >> { %838 = vadd.xlane.f32.xlu2 %v837_v23 }
 0x364   : >> { %v860_v28 = vpop.xlane.xlu1 %859 }
 0x365   : >> { %1225 = vrcp.f32 %v860_v28 }
 0x36b   : >> { %v1226_v29 = vpop.eup %1225 }
 0x36c   : >> { %v854_v30 = vpop.xlane.xlu1 %853  ;;  %v857_v31 = vpop.xlane.xlu2 %856  ;;  %v876_v32 = vmul.f32 %v1226_v29, %v1210_v61 }
 0x36d   : >> { %1227 = vrcp.f32 %v857_v31 }
 0x36e   : >> { %1092 = vmatpush.xpose.msk.msra.mxu2 %vm444_vm1, %v876_v32  ;;  %1229 = vrcp.f32 %v854_v30 }
 0x373   : >> { %v1228_v33 = vpop.eup %1227 }
 0x374   : >> { %v848_v34 = vpop.xlane.xlu1 %847  ;;  %v851_v35 = vpop.xlane.xlu2 %850  ;;  %v875_v36 = vmul.f32 %v1228_v33, %v1214_v6 }
 0x375   : >> { %v1230_v37 = vpop.eup %1229  ;;  %1231 = vrcp.f32 %v851_v35 }
 0x376   : >> { %1093 = vmatpush.xpose.msk.msra.mxu2 %vm444_vm1, %v875_v36  ;;  %1233 = vrcp.f32 %v848_v34  ;;  %v874_v38 = vmul.f32 %v1230_v37, %v1212_v4 }
 0x37a   : >> { %1094 = vmatpush.xpose.msk.msra.mxu2 %vm444_vm1, %v874_v38 }
 0x37b   : >> { %v1232_v39 = vpop.eup %1231 }
 0x37c   : >> { %v845_v40 = vpop.xlane.xlu2 %844  ;;  %v842_v41 = vpop.xlane.xlu1 %841  ;;  %v873_v42 = vmul.f32 %v1232_v39, %v1216_v14 }
 0x37d   : >> { %v1234_v43 = vpop.eup %1233  ;;  %1235 = vrcp.f32 %v845_v40 }
 0x37e   : >> { %1095 = vmatpush.xpose.msk.msra.mxu2 %vm444_vm1, %v873_v42  ;;  %1237 = vrcp.f32 %v842_v41  ;;  %v872_v44 = vmul.f32 %v1234_v43, %v1218_v16 }
 0x382   : >> { %1096 = vmatpush.xpose.msk.msra.mxu2 %vm444_vm1, %v872_v44 }
 0x383   : >> { %v1236_v45 = vpop.eup %1235 }
 0x384   : >> { %v839_v46 = vpop.xlane.xlu2 %838  ;;  %v871_v47 = vmul.f32 %v1236_v45, %v1220_v22  ;;  %v1238_v48 = vpop.eup %1237 }
 0x385   : >> { %1239 = vrcp.f32 %v839_v46  ;;  %v870_v49 = vmul.f32 %v1238_v48, %v1222_v24 }
 0x386   : >> { %1097 = vmatpush.xpose.msk.msra.mxu2 %vm444_vm1, %v871_v47 }
 0x38a   : >> { %1098 = vmatpush.xpose.msk.msra.mxu2 %vm444_vm1, %v870_v49 }
 0x38b   : >> { %v1240_v50 = vpop.eup %1239 }
 0x38c   : >> { %v869_v51 = vmul.f32 %v1240_v50, %v1224_v27 }
 0x38e   : >> { %1099 = vmatpush.xpose.msk.msra.mxu2 %vm444_vm1, %v869_v51 }
 0x391   : >> { %1100 = vmatmul.msk.f32.vlgmr.msra.gmra.mxu2 %vm444_vm1, %v591_v52 }
 0x411   : > { %583 = sbr.rel (!%p581_p0) target bundleno = 202 (0xca), region = 112 }
 0x414   : >> { %v921_v53 = vpop.f32.mrf.mxu2 }
 0x415   : >> { %925 = vst.msk [vmem:[%s924_s26] sm:$0xff] %vm444_vm1, %v921_v53 }
 0x416   : > { %1358 = shalt.err (!%p1355_p9)
}
 0x417   : > { %s1417_s3 = smov 128   ;;  %s1418_s5 = smov 8  }
 0x418   : > { %1134 = dma.vmem_to_hbm [thread:$0]  (%p1502_p5), %s940_s19, 512, %s942_s17, %s927_s20, %s1417_s3, %s1417_s3, %s1418_s5  }
 0x419 PF: > { %p1156_p10 = scmp.ge.s32.totalorder %s1405_s30, 2  ;;  %s956_s21 = sand.u32 1, %s1393_s27  }
 0x41a   : > { %s957_s12 = scalar_lea.sflag [#allocation7], %s956_s21 }
 0x41b   : > { %p1147_p11 = pnand %p1156_p10, %p1506_p6 }
 0x41d   : > { %p1148_p12 = pneg %p1147_p11 }
 0x41f   : > { %1388 = dma.done.wait (%p1148_p12), %s957_s12, 512  }
 0x420   : > { %1390 = vsyncadd (%p1148_p12), %s957_s12, 4294966784  ;;  %p20_p13 = scmp.ge.s32.totalorder %s1489_s11, 4   ;;  %s1753_s27 = smov %s1397_s28 }
 0x421   : > { %s1754_s28 = smov %s1401_s29  ;;  %s1755_s29 = smov %s1500_s14 }
 0x422   : > { %s1756_s30 = smov %s1489_s11  ;;  %22 = sbr.rel (!%p20_p13) target bundleno = 8 (0x8), region = 123 }
 0x427   :  { %963 = vsyncpa [#allocation6], 1 }
 0x428   :  { %965 = vsyncpa [#allocation6 + $0x1], 1 }
 0x429   :  { %966 = vsyncpa [#allocation9], 1 }
 0x42a   :  { %967 = vsyncpa [#allocation7], 1 }
 0x42b   :  { %969 = vsyncpa [#allocation7 + $0x1], 1 }

</bundles_post_ra>
